<compile_context>
chip_gen: v5e
topology: v5e:2x2
jax: 0.10.0
libtpu: 0.0.40
codegen_flags: <defaults>
</compile_context>

<pallas_src>
import jax
import jax.numpy as jnp
from jax.experimental import pallas as pl
from jax.experimental.pallas import tpu as pltpu

LANE = 128
SUB = 8
NUM_SLICES = 2           # leading "parallel" grid axis (both TensorCores on v7x)
CHUNK_ROWS = 512         # inner accumulation chunk (bounds temporary live ranges)
BLOCK_BYTES = 2 << 20    # ~2 MiB per input per pipeline buffer (dtype-scaled)
VMEM_LIMIT = 32 << 20    # explicit scoped-VMEM limit; safe on v5e/v6e/v7x


def _cdiv(a, b):
    return -(-a // b)


def _round_up(a, b):
    return _cdiv(a, b) * b


def _pick_chunk(rows_per_block: int) -> int:
    """Largest chunk (<= CHUNK_ROWS, multiple of SUB) dividing rows_per_block."""
    if rows_per_block <= CHUNK_ROWS:
        return rows_per_block
    for c in (CHUNK_ROWS, 256, 128, 64, 32, 16, 8):
        if rows_per_block % c == 0:
            return c
    return SUB


def _make_sse_kernel(rows: int, rows_per_block: int, chunk: int,
                     tiles_per_slice: int, num_slices: int):
    """Per-slice sum-of-squared-errors into a resident (8,128) f32 block."""
    num_tiles = _cdiv(rows, rows_per_block)
    last_tile = num_tiles - 1
    has_partial = (rows % rows_per_block) != 0
    has_overhang = num_slices * tiles_per_slice > num_tiles
    valid_rows = rows - last_tile * rows_per_block      # rows in the last tile (static)
    num_chunks = rows_per_block // chunk
    sub_per_chunk = chunk // SUB

    def chunk_sse(x_ref, y_ref, r0, masked):
        xs = x_ref[pl.ds(r0, chunk), :].astype(jnp.float32)
        ys = y_ref[pl.ds(r0, chunk), :].astype(jnp.float32)
        d = xs - ys
        sq = d * d
        if masked:
            # Row-granularity mask against a STATIC bound (only the one
            # overhanging tile ever takes this path).  jnp.where selects 0
            # even if the undefined overhang rows contain NaN/Inf.
            row = r0 + jax.lax.broadcasted_iota(jnp.int32, (chunk, LANE), 0)
            sq = jnp.where(row < valid_rows, sq, 0.0)
        if sub_per_chunk == 1:
            return sq
        return sq.reshape(sub_per_chunk, SUB, LANE).sum(axis=0)

    def block_sse(x_ref, y_ref, masked):
        if num_chunks == 1:
            return chunk_sse(x_ref, y_ref, 0, masked)

        def body(j, acc):
            r0 = pl.multiple_of(j * chunk, chunk)
            return acc + chunk_sse(x_ref, y_ref, r0, masked)

        return jax.lax.fori_loop(0, num_chunks, body,
                                 jnp.zeros((SUB, LANE), jnp.float32))

    def kernel(x_ref, y_ref, o_ref):
        s = pl.program_id(0)       # megacore slice
        i = pl.program_id(1)       # reduction step within the slice
        t = s * tiles_per_slice + i

        @pl.when(i == 0)
        def _():
            o_ref[...] = jnp.zeros_like(o_ref)

        # ---- full (unmasked) tiles -------------------------------------
        if (not has_partial) or num_tiles > 1:
            if has_partial:
                full_cond = t < last_tile          # last tile handled below
            elif has_overhang:
                full_cond = t < num_tiles          # skip clamped duplicates
            else:
                full_cond = None                   # every grid step is a full tile

            if full_cond is None:
                o_ref[...] += block_sse(x_ref, y_ref, False)
            else:
                @pl.when(full_cond)
                def _():
                    o_ref[...] += block_sse(x_ref, y_ref, False)

        # ---- the single partial (row-masked) tile, if any ---------------
        if has_partial:
            @pl.when(t == last_tile)
            def _():
                o_ref[...] += block_sse(x_ref, y_ref, True)

    return kernel


def rmse_loss(x, y, *, block_bytes: int = BLOCK_BYTES):
    """RMSE over all elements; matches torch.sqrt(F.mse_loss(x.float(), y.float()))."""
    assert x.shape == y.shape, "input/target shapes must match (default MSELoss)"
    n = int(x.size)
    if n == 0:
        return jnp.float32(jnp.nan)            # torch: mean of empty -> nan

    xf = x.reshape(-1)
    yf = y.reshape(-1)

    n_body = (n // LANE) * LANE                # 128-aligned body handled by the kernel
    rem = n - n_body

    sse = jnp.float32(0.0)
    if rem:
        # Ragged (<128 element) tail: tiny jnp epilogue, no padding / extra copy
        # of the body in the aligned case.
        tx = jax.lax.slice(xf, (n_body,), (n,)).astype(jnp.float32)
        ty = jax.lax.slice(yf, (n_body,), (n,)).astype(jnp.float32)
        sse = sse + jnp.sum((tx - ty) ** 2)

    if n_body:
        x_body = xf if rem == 0 else jax.lax.slice(xf, (0,), (n_body,))
        y_body = yf if rem == 0 else jax.lax.slice(yf, (0,), (n_body,))
        rows = n_body // LANE
        x2 = x_body.reshape(rows, LANE)
        y2 = y_body.reshape(rows, LANE)

        # Dtype-scaled row tile (~block_bytes per input per pipeline buffer).
        itemsize = max(jnp.dtype(x.dtype).itemsize, jnp.dtype(y.dtype).itemsize)
        rt = max(SUB, (block_bytes // (itemsize * LANE)) // SUB * SUB)
        rt = min(rt, _round_up(rows, SUB))
        chunk = _pick_chunk(rt)

        num_tiles = _cdiv(rows, rt)
        num_slices = min(NUM_SLICES, num_tiles)
        tiles_per_slice = _cdiv(num_tiles, num_slices)
        last_tile = num_tiles - 1

        def in_map(s, i):
            # Clamp so DMAs never address a fully out-of-bounds block; the
            # kernel's scalar guards skip any logically out-of-range tile.
            return (jnp.minimum(s * tiles_per_slice + i, last_tile), 0)

        bytes_accessed = (n_body * (jnp.dtype(x.dtype).itemsize
                                    + jnp.dtype(y.dtype).itemsize)
                          + num_slices * SUB * LANE * 4)

        partials = pl.pallas_call(
            _make_sse_kernel(rows, rt, chunk, tiles_per_slice, num_slices),
            out_shape=jax.ShapeDtypeStruct((num_slices * SUB, LANE), jnp.float32),
            grid_spec=pltpu.PrefetchScalarGridSpec(
                num_scalar_prefetch=0,
                grid=(num_slices, tiles_per_slice),
                in_specs=[
                    pl.BlockSpec((rt, LANE), in_map),
                    pl.BlockSpec((rt, LANE), in_map),
                ],
                out_specs=pl.BlockSpec((SUB, LANE), lambda s, i: (s, 0)),
            ),
            compiler_params=pltpu.CompilerParams(
                dimension_semantics=("parallel", "arbitrary"),
                vmem_limit_bytes=VMEM_LIMIT,
            ),
            cost_estimate=pl.CostEstimate(
                flops=3 * n_body, transcendentals=0,
                bytes_accessed=int(bytes_accessed)),
        )(x2, y2)

        sse = sse + jnp.sum(partials)

    return jnp.sqrt(sse / jnp.float32(n))


def _ref_rmse(x, y):
    return jnp.sqrt(jnp.mean((x.astype(jnp.float32) - y.astype(jnp.float32)) ** 2))


if __name__ == "__main__":
    key = jax.random.PRNGKey(0)
    k1, k2, k3, k4, k5, k6 = jax.random.split(key, 6)

    # 1) Small NCHW-like f32 tensors (lane-aligned path).
    shape = (2, 4, 16, 16)
    x = jax.random.normal(k1, shape, dtype=jnp.float32)
    y = jax.random.normal(k2, shape, dtype=jnp.float32)
    rmse = rmse_loss(x, y)
    jax.block_until_ready(rmse)
    assert jnp.allclose(rmse, _ref_rmse(x, y), rtol=1e-5, atol=1e-6), rmse

    # 2) Tiny ragged bf16 case (<128 elements: pure wrapper tail path).
    xb = jax.random.normal(k3, (3, 5, 7), dtype=jnp.bfloat16)
    yb = jax.random.normal(k4, (3, 5, 7), dtype=jnp.bfloat16)
    rmse2 = rmse_loss(xb, yb)
    jax.block_until_ready(rmse2)
    assert jnp.allclose(rmse2, _ref_rmse(xb, yb), rtol=1e-5, atol=1e-6), rmse2

    # 3) Ragged f32 case (kernel body + partial row tile + jnp tail).
    xr = jax.random.normal(k5, (5, 1000), dtype=jnp.float32)
    yr = jax.random.normal(k6, (5, 1000), dtype=jnp.float32)
    rmse3 = rmse_loss(xr, yr)
    jax.block_until_ready(rmse3)
    assert jnp.allclose(rmse3, _ref_rmse(xr, yr), rtol=1e-5, atol=1e-6), rmse3

    # 4) Same data with a tiny block to exercise both slices, the overhang
    #    guard and the partial-tile mask.
    rmse4 = rmse_loss(xr, yr, block_bytes=SUB * LANE * 4)
    jax.block_until_ready(rmse4)
    assert jnp.allclose(rmse4, _ref_rmse(xr, yr), rtol=1e-5, atol=1e-6), rmse4

    print("KERNEL_OK")
</pallas_src>

<mosaic_0001>
module attributes {stable_mosaic.version = 11 : i64} {
  func.func @kernel(%arg0: i32, %arg1: i32, %arg2: memref<16x128xf32, #tpu.memory_space<vmem>>, %arg3: memref<16x128xf32, #tpu.memory_space<vmem>>, %arg4: memref<8x128xf32, #tpu.memory_space<vmem>>) attributes {dimension_semantics = [#tpu.dimension_semantics<parallel>, #tpu.dimension_semantics<arbitrary>], iteration_bounds = array<i64: 1, 1>, scalar_prefetch = 0 : i64, scratch_operands = 0 : i64, tpu.core_type = #tpu.core_type<tc>, window_params = [{transform_indices = @transform_0, window_bounds = array<i64: 16, 128>}, {transform_indices = @transform_1, window_bounds = array<i64: 16, 128>}, {transform_indices = @transform_2, window_bounds = array<i64: 8, 128>}]} {
    %c0_i32 = arith.constant 0 : i32
    %0 = arith.cmpi eq, %arg1, %c0_i32 : i32
    %1 = arith.extui %0 : i1 to i32
    %c0_i32_0 = arith.constant 0 : i32
    %2 = arith.cmpi ne, %1, %c0_i32_0 : i32
    scf.if %2 {
      %cst_8 = arith.constant 0.000000e+00 : f32
      %12 = vector.broadcast %cst_8 : f32 to vector<8x128xf32>
      %c0_9 = arith.constant 0 : index
      %c0_10 = arith.constant 0 : index
      %13 = vector.load %arg4[%c0_9, %c0_10] : memref<8x128xf32, #tpu.memory_space<vmem>>, vector<8x128xf32>
      tpu.vector_store %arg4[%c0_9, %c0_10], %12 {strides = array<i32>} : memref<8x128xf32, #tpu.memory_space<vmem>>, vector<8x128xf32>,
    } else {
    }
    %c0 = arith.constant 0 : index
    %c0_1 = arith.constant 0 : index
    %3 = vector.load %arg4[%c0, %c0_1] : memref<8x128xf32, #tpu.memory_space<vmem>>, vector<8x128xf32>
    %c0_2 = arith.constant 0 : index
    %c0_3 = arith.constant 0 : index
    %4 = vector.load %arg2[%c0_2, %c0_3] : memref<16x128xf32, #tpu.memory_space<vmem>>, vector<16x128xf32>
    %c0_4 = arith.constant 0 : index
    %c0_5 = arith.constant 0 : index
    %5 = vector.load %arg3[%c0_4, %c0_5] : memref<16x128xf32, #tpu.memory_space<vmem>>, vector<16x128xf32>
    %6 = arith.subf %4, %5 : vector<16x128xf32>
    %7 = arith.mulf %6, %6 : vector<16x128xf32>
    %8 = vector.shape_cast %7 : vector<16x128xf32> to vector<2x8x128xf32>
    %cst = arith.constant dense<0.000000e+00> : vector<8x128xf32>
    %9 = vector.multi_reduction <add>, %8, %cst [0] : vector<2x8x128xf32> to vector<8x128xf32>
    %10 = arith.addf %3, %9 : vector<8x128xf32>
    %c0_6 = arith.constant 0 : index
    %c0_7 = arith.constant 0 : index
    %11 = vector.load %arg4[%c0_6, %c0_7] : memref<8x128xf32, #tpu.memory_space<vmem>>, vector<8x128xf32>
    tpu.vector_store %arg4[%c0_6, %c0_7], %10 {strides = array<i32>} : memref<8x128xf32, #tpu.memory_space<vmem>>, vector<8x128xf32>,
    return
  }
  func.func @transform_0(%arg0: i32, %arg1: i32) -> (i32, i32) {
    %c1_i32 = arith.constant 1 : i32
    %0 = arith.muli %arg0, %c1_i32 : i32
    %1 = arith.addi %0, %arg1 : i32
    %c0_i32 = arith.constant 0 : i32
    %2 = arith.minsi %1, %c0_i32 : i32
    %c0_i32_0 = arith.constant 0 : i32
    %c0_i32_1 = arith.constant 0 : i32
    return %2, %c0_i32_0 : i32, i32
  }
  func.func @transform_1(%arg0: i32, %arg1: i32) -> (i32, i32) {
    %c1_i32 = arith.constant 1 : i32
    %0 = arith.muli %arg0, %c1_i32 : i32
    %1 = arith.addi %0, %arg1 : i32
    %c0_i32 = arith.constant 0 : i32
    %2 = arith.minsi %1, %c0_i32 : i32
    %c0_i32_0 = arith.constant 0 : i32
    %c0_i32_1 = arith.constant 0 : i32
    return %2, %c0_i32_0 : i32, i32
  }
  func.func @transform_2(%arg0: i32, %arg1: i32) -> (i32, i32) {
    %c0_i32 = arith.constant 0 : i32
    %c0_i32_0 = arith.constant 0 : i32
    return %arg0, %c0_i32 : i32, i32
  }
}

</mosaic_0001>

<bundles_post_ra>
// kernel: tpu_custom_call.1
= control target key start
LH: loop header
LB: loop body
LE: loop exit
PB: predicated region body
PF: predicated region fallthrough
CT: control target
= control target key end

     0   :  { %7 = vsyncpa [#allocation3], 0  ;;  %s216_s0 = inlined_call_operand.hbm [shape: f32[16,128], index: 0, kind: input, shape index: {}]   ;;  %s217_s1 = inlined_call_operand.hbm [shape: f32[16,128], index: 1, kind: input, shape index: {}]   ;;  %s218_s2 = inlined_call_operand.hbm [shape: f32[8,128], index: 2, kind: output, shape index: {}]  }
   0x1   :  { %8 = vsyncpa [#allocation6], 0 }
   0x2   :  { %9 = vsyncpa [#allocation4], 0  ;;  %s20_s11 = sshll.u32 %s216_s0, 4  ;;  %s187_s12 = smov [#allocation2]   ;;  %s21_s11 = int_to_ptr.hbm [resolvable:$true] %s20_s11 }
   0x3   :  { %s22_s13 = sshll.u32 %s187_s12, 4  ;;  %s39_s16 = sshll.u32 %s217_s1, 4  ;;  %s23_s13 = int_to_ptr.vmem [resolvable:$true] %s22_s13  ;;  %s40_s16 = int_to_ptr.hbm [resolvable:$true] %s39_s16 }
   0x4   :  { %s188_s17 = smov 128   ;;  %s189_s18 = smov 8  }
   0x5   :  { %28 = dma.hbm_to_vmem [thread:$0]  %s21_s11, 256, %s23_s13, [#allocation3], %s188_s17, %s188_s17, %s189_s18  }
   0x6   :  { %s190_s19 = smov [#allocation5]  }
   0x7   :  { %s41_s20 = sshll.u32 %s190_s19, 4  ;;  %s42_s20 = int_to_ptr.vmem [resolvable:$true] %s41_s20 }
   0x8   :  { %47 = dma.hbm_to_vmem [thread:$0]  %s40_s16, 256, %s42_s20, [#allocation6], %s188_s17, %s188_s17, %s189_s18  }
   0x9   :  { %181 = dma.done.wait [#allocation3], 256  }
   0xa   :  { %182 = vsyncadd [#allocation3], 4294967040 }
   0xb   :  { %183 = dma.done.wait [#allocation6], 256  }
   0xc   :  { %184 = vsyncadd [#allocation6], 4294967040  ;;  %v70_v0 = vld [vmem:[#allocation2] sm:$0xff]  ;;  %v71_v1 = vld [vmem:[#allocation2 + $0x8] sm:$0xff]  ;;  %s191_s0 = smov [#allocation7]   ;;  %s88_s23 = sshll.u32 %s218_s2, 4  ;;  %s89_s23 = int_to_ptr.hbm [resolvable:$true] %s88_s23 }
   0xd   :  { %v72_v2 = vld [vmem:[#allocation5] sm:$0xff]  ;;  %v73_v3 = vld [vmem:[#allocation5 + $0x8] sm:$0xff]  ;;  %s86_s1 = sshll.u32 %s191_s0, 4  ;;  %s87_s1 = int_to_ptr.vmem [resolvable:$true] %s86_s1 }
   0xe   :  { %v74_v4 = vsub.f32 %v70_v0, %v72_v2  ;;  %v75_v5 = vsub.f32 %v71_v1, %v73_v3 }
  0x10   :  { %v76_v6 = vmul.f32 %v74_v4, %v74_v4  ;;  %v77_v7 = vmul.f32 %v75_v5, %v75_v5 }
  0x12   :  { %v78_v8 = vadd.f32 %v77_v7, %v76_v6 }
  0x14   :  { %80 = vst [vmem:[#allocation7] sm:$0xff] %v78_v8 }
  0x15   :  { %91 = dma.vmem_to_hbm [thread:$0]  %s87_s1, 128, %s89_s23, [#allocation4]  }
  0x16   :  { %185 = dma.done.wait [#allocation4], 128  }
  0x17   :  { %186 = vsyncadd [#allocation4], 4294967168 }
  0x18   :  { %96 = vsyncpa [#allocation3], 1 }
  0x19   :  { %97 = vsyncpa [#allocation6], 1 }
  0x1a   :  { %98 = vsyncpa [#allocation4], 1 }

</bundles_post_ra>
